<compile_context>
chip_gen: v7x
topology: tpu7x:2x2x1
jax: 0.10.0
libtpu: 0.0.40
codegen_flags: <defaults>
</compile_context>

<pallas_src>
import functools

import jax
import jax.numpy as jnp
from jax.experimental import pallas as pl
from jax.experimental.pallas import tpu as pltpu

EPS = 1e-08


def _round_up(x, m):
    return ((x + m - 1) // m) * m


def _device_kind():
    try:
        return jax.devices()[0].device_kind.lower()
    except Exception:
        return ""


def _ce_kernel(pred_ref, true_ref, out_ref, *, n_rows, row_tile,
               tiles_per_split):
    s = pl.program_id(0)          # parallel split (megacore on v7x)
    i = pl.program_id(2)          # reduction over row tiles (last grid axis)

    @pl.when(i == 0)
    def _():
        out_ref[...] = jnp.zeros_like(out_ref)

    p = pred_ref[...].astype(jnp.float32)
    t = true_ref[...].astype(jnp.float32)
    contrib = t * jnp.log(p + EPS)

    def _accum(x):
        # Fold rows to an (8, class_tile) slab with pure VPU adds; the reshape
        # is (8,128)-layout preserving so it costs nothing.
        out_ref[...] += x.reshape(row_tile // 8, 8, -1).sum(axis=0)

    tile_idx = s * tiles_per_split + i
    tile_end = (tile_idx + 1) * row_tile

    # Hot path: interior tiles contain no invalid rows -> no mask work at all.
    @pl.when(tile_end <= n_rows)
    def _():
        _accum(contrib)

    # Cold path: only the tail tile (and fully clamped re-read tiles of an
    # over-allocated split) pays for the (row_tile, 1) row mask + select.
    @pl.when(tile_end > n_rows)
    def _():
        row_ids = tile_idx * row_tile + jax.lax.broadcasted_iota(
            jnp.int32, (row_tile, 1), 0)
        _accum(jnp.where(row_ids < n_rows, contrib, 0.0))


def crossentropy_loss(pred, true, *, row_tile=None, class_tile=None,
                      num_splits=None):
    assert pred.shape == true.shape
    classes = pred.shape[-1]
    n_rows = 1
    for d in pred.shape[:-1]:
        n_rows *= d

    pred2d = pred.reshape(n_rows, classes)
    true2d = true.reshape(n_rows, classes)

    kind = _device_kind()
    is_v7x = "v7" in kind

    # The 2-way split only helps on dual-TensorCore chips (v7x); on single-TC
    # v5e/v6e it is a serial loop plus a padded re-read tile -> pure overhead.
    if num_splits is None:
        num_splits = 2 if is_v7x else 1

    # Lane (class) tiling for huge vocabularies keeps blocks in the ~2 MiB
    # sweet spot instead of collapsing row_tile to 8.
    if class_tile is None:
        class_tile = classes
        if classes > 32768:
            for cand in (32768, 16384, 8192):
                if classes % cand == 0:
                    class_tile = cand
                    break
    assert class_tile == classes or (classes % class_tile == 0
                                     and class_tile % 128 == 0)
    n_class_tiles = classes // class_tile

    itemsize = max(jnp.dtype(pred.dtype).itemsize,
                   jnp.dtype(true.dtype).itemsize)
    if row_tile is None:
        # ~2 MiB per input block: >=85% of measured HBM roofline, and small
        # enough to double/triple-buffer two inputs on every generation.
        target_block_bytes = 2 * 1024 * 1024
        row_tile = target_block_bytes // (class_tile * itemsize)
        rows_per_split = pl.cdiv(n_rows, num_splits)
        row_tile = min(row_tile, _round_up(rows_per_split, 8))
        row_tile = max(8, (row_tile // 8) * 8)
    assert row_tile % 8 == 0

    total_tiles = pl.cdiv(n_rows, row_tile)
    num_splits = max(1, min(num_splits, total_tiles))
    tiles_per_split = pl.cdiv(total_tiles, num_splits)

    # VMEM accounting, communicated explicitly to Mosaic (never rely on the
    # scoped default): 2 inputs x n_buffers blocks + double-buffered output.
    block_in_bytes = row_tile * class_tile * itemsize
    out_block_bytes = 8 * class_tile * 4
    vmem_cap = (36 if is_v7x else 48) * 1024 * 1024
    n_buffers = 2
    if is_v7x and (2 * 3 * block_in_bytes + 2 * out_block_bytes
                   + (4 << 20)) <= vmem_cap:
        n_buffers = 3   # third buffer hides DMA issue jitter at v7x HBM rates
    footprint = 2 * n_buffers * block_in_bytes + 2 * out_block_bytes
    vmem_limit = max(min(vmem_cap, footprint + (4 << 20)),
                     footprint + (1 << 20))

    def in_map(s, c, i):
        # Clamp so an over-allocated split step re-reads the last valid block
        # (its rows get fully masked in-kernel) instead of DMA-ing OOB.
        return (jnp.minimum(s * tiles_per_split + i, total_tiles - 1), c)

    def _in_spec():
        if n_buffers > 2:
            try:
                return pl.BlockSpec((row_tile, class_tile), in_map,
                                    pipeline_mode=pl.Buffered(n_buffers))
            except TypeError:   # older jax without pipeline_mode on BlockSpec
                pass
        return pl.BlockSpec((row_tile, class_tile), in_map)

    kernel = functools.partial(_ce_kernel, n_rows=n_rows, row_tile=row_tile,
                               tiles_per_split=tiles_per_split)

    partials = pl.pallas_call(
        kernel,
        out_shape=jax.ShapeDtypeStruct((num_splits * 8, classes), jnp.float32),
        grid_spec=pltpu.PrefetchScalarGridSpec(
            num_scalar_prefetch=0,
            grid=(num_splits, n_class_tiles, tiles_per_split),
            in_specs=[_in_spec(), _in_spec()],
            out_specs=pl.BlockSpec((8, class_tile), lambda s, c, i: (s, c)),
        ),
        compiler_params=pltpu.CompilerParams(
            dimension_semantics=("parallel", "arbitrary", "arbitrary"),
            vmem_limit_bytes=int(vmem_limit)),
    )(pred2d, true2d)

    # Tiny final reduction (num_splits * 8 * classes elems) + normalization.
    return -(jnp.sum(partials) / jnp.float32(n_rows))


def _reference(pred, true):
    return -jnp.mean(jnp.sum(true * jnp.log(pred + EPS), axis=-1))


if __name__ == "__main__":
    key = jax.random.PRNGKey(0)
    kp, kt = jax.random.split(key)

    # Main case: batch=2, seq=8, classes=128 (rows divide tiles evenly).
    B, S, C = 2, 8, 128
    logits = jax.random.normal(kp, (B, S, C), dtype=jnp.float32)
    pred = jax.nn.softmax(logits, axis=-1)               # probabilities
    labels = jax.random.randint(kt, (B, S), 0, C)
    true = jax.nn.one_hot(labels, C, dtype=jnp.float32)  # one-hot targets

    loss = crossentropy_loss(pred, true)
    jax.block_until_ready(loss)
    ref = _reference(pred, true)
    assert jnp.allclose(loss, ref, rtol=1e-5, atol=1e-5), (loss, ref)

    # Ragged case: rows not a multiple of the row tile -> exercises the cold
    # masked branch.
    B2, S2 = 3, 5
    logits2 = jax.random.normal(kp, (B2, S2, C), dtype=jnp.float32)
    pred2 = jax.nn.softmax(logits2, axis=-1)
    labels2 = jax.random.randint(kt, (B2, S2), 0, C)
    true2 = jax.nn.one_hot(labels2, C, dtype=jnp.float32)

    loss2 = crossentropy_loss(pred2, true2)
    jax.block_until_ready(loss2)
    ref2 = _reference(pred2, true2)
    assert jnp.allclose(loss2, ref2, rtol=1e-5, atol=1e-5), (loss2, ref2)

    print("KERNEL_OK")
</pallas_src>

<mosaic_0001>
module attributes {stable_mosaic.version = 11 : i64} {
  func.func @_ce_kernel(%arg0: i32, %arg1: i32, %arg2: i32, %arg3: memref<16x128xf32, #tpu.memory_space<vmem>>, %arg4: memref<16x128xf32, #tpu.memory_space<vmem>>, %arg5: memref<8x128xf32, #tpu.memory_space<vmem>>) attributes {dimension_semantics = [#tpu.dimension_semantics<parallel>, #tpu.dimension_semantics<arbitrary>, #tpu.dimension_semantics<arbitrary>], iteration_bounds = array<i64: 1, 1, 1>, scalar_prefetch = 0 : i64, scratch_operands = 0 : i64, tpu.core_type = #tpu.core_type<tc>, window_params = [{transform_indices = @transform_0, window_bounds = array<i64: 16, 128>}, {transform_indices = @transform_1, window_bounds = array<i64: 16, 128>}, {transform_indices = @transform_2, window_bounds = array<i64: 8, 128>}]} {
    %c0_i32 = arith.constant 0 : i32
    %0 = arith.cmpi eq, %arg2, %c0_i32 : i32
    %1 = arith.extui %0 : i1 to i32
    %c0_i32_0 = arith.constant 0 : i32
    %2 = arith.cmpi ne, %1, %c0_i32_0 : i32
    scf.if %2 {
      %cst_9 = arith.constant 0.000000e+00 : f32
      %19 = vector.broadcast %cst_9 : f32 to vector<8x128xf32>
      %c0_10 = arith.constant 0 : index
      %c0_11 = arith.constant 0 : index
      %20 = vector.load %arg5[%c0_10, %c0_11] : memref<8x128xf32, #tpu.memory_space<vmem>>, vector<8x128xf32>
      tpu.vector_store %arg5[%c0_10, %c0_11], %19 {strides = array<i32>} : memref<8x128xf32, #tpu.memory_space<vmem>>, vector<8x128xf32>,
    } else {
    }
    %c0 = arith.constant 0 : index
    %c0_1 = arith.constant 0 : index
    %3 = vector.load %arg3[%c0, %c0_1] : memref<16x128xf32, #tpu.memory_space<vmem>>, vector<16x128xf32>
    %c0_2 = arith.constant 0 : index
    %c0_3 = arith.constant 0 : index
    %4 = vector.load %arg4[%c0_2, %c0_3] : memref<16x128xf32, #tpu.memory_space<vmem>>, vector<16x128xf32>
    %cst = arith.constant 9.99999993E-9 : f32
    %5 = vector.broadcast %cst : f32 to vector<16x128xf32>
    %6 = arith.addf %3, %5 : vector<16x128xf32>
    %7 = math.log %6 : vector<16x128xf32>
    %8 = arith.mulf %4, %7 : vector<16x128xf32>
    %c1_i32 = arith.constant 1 : i32
    %9 = arith.muli %arg0, %c1_i32 : i32
    %10 = arith.addi %9, %arg2 : i32
    %c1_i32_4 = arith.constant 1 : i32
    %11 = arith.addi %10, %c1_i32_4 : i32
    %c16_i32 = arith.constant 16 : i32
    %12 = arith.muli %11, %c16_i32 : i32
    %c16_i32_5 = arith.constant 16 : i32
    %13 = arith.cmpi sle, %12, %c16_i32_5 : i32
    %14 = arith.extui %13 : i1 to i32
    %c0_i32_6 = arith.constant 0 : i32
    %15 = arith.cmpi ne, %14, %c0_i32_6 : i32
    scf.if %15 {
      %c0_9 = arith.constant 0 : index
      %c0_10 = arith.constant 0 : index
      %19 = vector.load %arg5[%c0_9, %c0_10] : memref<8x128xf32, #tpu.memory_space<vmem>>, vector<8x128xf32>
      %20 = vector.shape_cast %8 : vector<16x128xf32> to vector<2x8x128xf32>
      %cst_11 = arith.constant dense<0.000000e+00> : vector<8x128xf32>
      %21 = vector.multi_reduction <add>, %20, %cst_11 [0] : vector<2x8x128xf32> to vector<8x128xf32>
      %22 = arith.addf %19, %21 : vector<8x128xf32>
      %c0_12 = arith.constant 0 : index
      %c0_13 = arith.constant 0 : index
      %23 = vector.load %arg5[%c0_12, %c0_13] : memref<8x128xf32, #tpu.memory_space<vmem>>, vector<8x128xf32>
      tpu.vector_store %arg5[%c0_12, %c0_13], %22 {strides = array<i32>} : memref<8x128xf32, #tpu.memory_space<vmem>>, vector<8x128xf32>,
    } else {
    }
    %c16_i32_7 = arith.constant 16 : i32
    %16 = arith.cmpi sgt, %12, %c16_i32_7 : i32
    %17 = arith.extui %16 : i1 to i32
    %c0_i32_8 = arith.constant 0 : i32
    %18 = arith.cmpi ne, %17, %c0_i32_8 : i32
    scf.if %18 {
      %c16_i32_9 = arith.constant 16 : i32
      %19 = arith.muli %10, %c16_i32_9 : i32
      %20 = tpu.iota {dimensions = array<i32: 0>} : vector<16x1xi32>
      %21 = vector.broadcast %19 : i32 to vector<16x1xi32>
      %22 = arith.addi %21, %20 : vector<16x1xi32>
      %c16_i32_10 = arith.constant 16 : i32
      %23 = vector.broadcast %c16_i32_10 : i32 to vector<16x1xi32>
      %24 = arith.cmpi slt, %22, %23 : vector<16x1xi32>
      %cst_11 = arith.constant 0.000000e+00 : f32
      %25 = vector.shape_cast %24 : vector<16x1xi1> to vector<16x1xi1>
      %26 = vector.broadcast %25 : vector<16x1xi1> to vector<16x128xi1>
      %27 = vector.broadcast %cst_11 : f32 to vector<16x128xf32>
      %28 = arith.select %26, %8, %27 : vector<16x128xi1>, vector<16x128xf32>
      %c0_12 = arith.constant 0 : index
      %c0_13 = arith.constant 0 : index
      %29 = vector.load %arg5[%c0_12, %c0_13] : memref<8x128xf32, #tpu.memory_space<vmem>>, vector<8x128xf32>
      %30 = vector.shape_cast %28 : vector<16x128xf32> to vector<2x8x128xf32>
      %cst_14 = arith.constant dense<0.000000e+00> : vector<8x128xf32>
      %31 = vector.multi_reduction <add>, %30, %cst_14 [0] : vector<2x8x128xf32> to vector<8x128xf32>
      %32 = arith.addf %29, %31 : vector<8x128xf32>
      %c0_15 = arith.constant 0 : index
      %c0_16 = arith.constant 0 : index
      %33 = vector.load %arg5[%c0_15, %c0_16] : memref<8x128xf32, #tpu.memory_space<vmem>>, vector<8x128xf32>
      tpu.vector_store %arg5[%c0_15, %c0_16], %32 {strides = array<i32>} : memref<8x128xf32, #tpu.memory_space<vmem>>, vector<8x128xf32>,
    } else {
    }
    return
  }
  func.func @transform_0(%arg0: i32, %arg1: i32, %arg2: i32) -> (i32, i32) {
    %c1_i32 = arith.constant 1 : i32
    %0 = arith.muli %arg0, %c1_i32 : i32
    %1 = arith.addi %0, %arg2 : i32
    %c0_i32 = arith.constant 0 : i32
    %2 = arith.minsi %1, %c0_i32 : i32
    %c0_i32_0 = arith.constant 0 : i32
    return %2, %arg1 : i32, i32
  }
  func.func @transform_1(%arg0: i32, %arg1: i32, %arg2: i32) -> (i32, i32) {
    %c1_i32 = arith.constant 1 : i32
    %0 = arith.muli %arg0, %c1_i32 : i32
    %1 = arith.addi %0, %arg2 : i32
    %c0_i32 = arith.constant 0 : i32
    %2 = arith.minsi %1, %c0_i32 : i32
    %c0_i32_0 = arith.constant 0 : i32
    return %2, %arg1 : i32, i32
  }
  func.func @transform_2(%arg0: i32, %arg1: i32, %arg2: i32) -> (i32, i32) {
    %c0_i32 = arith.constant 0 : i32
    return %arg0, %arg1 : i32, i32
  }
}

</mosaic_0001>

<bundles_post_ra>
// kernel: tpu_custom_call.1
= control target key start
LH: loop header
LB: loop body
LE: loop exit
PB: predicated region body
PF: predicated region fallthrough
CT: control target
= control target key end

     0   :  { %7 = vsyncpa [#allocation3], 0  ;;  %s269_s0 = inlined_call_operand.hbm [shape: f32[16,128], index: 0, kind: input, shape index: {}]   ;;  %s270_s1 = inlined_call_operand.hbm [shape: f32[16,128], index: 1, kind: input, shape index: {}]   ;;  %s271_s2 = inlined_call_operand.hbm [shape: f32[8,128], index: 2, kind: output, shape index: {}]  }
   0x1   :  { %8 = vsyncpa [#allocation6], 0 }
   0x2   :  { %9 = vsyncpa [#allocation4], 0  ;;  %s213_s9 = smov [#allocation2]   ;;  %s141_s13 = scalar_lea.hbm %s269_s0, 256 }
   0x3   :  { %s21_s10 = sshll.u32 %s213_s9, 4  ;;  %p142_p0 = scmp.ne.s32.totalorder %s269_s0, %s141_s13  ;;  %s22_s10 = int_to_ptr.vmem [resolvable:$true] %s21_s10 }
   0x4   :  { %p145_p1 = scmp.lt.u32.totalorder %s141_s13, %s269_s0 }
   0x6   :  { %p147_p2 = pnand %p145_p1, %p142_p0 }
   0x8   :  { %150 = shalt.err (!%p147_p2)
}
   0x9   :  { %s151_s18 = scalar_lea.vmem %s22_s10, 256  ;;  %p156_p4 = scmp.lt.s32.totalorder %s22_s10, %s22_s10 }
   0xa   :  { %p152_p3 = scmp.ne.s32.totalorder %s22_s10, %s151_s18  ;;  %p157_p5 = scmp.lt.s32.totalorder %s151_s18, %s151_s18 }
   0xc   :  { %p158_p6 = por %p157_p5, %p156_p4 }
   0xe   :  { %p159_p7 = pnand %p158_p6, %p152_p3 }
  0x10   :  { %162 = shalt.err (!%p159_p7)
}
  0x11   :  { %s214_s19 = smov 128   ;;  %s215_s20 = smov 8  }
  0x12   :  { %27 = dma.hbm_to_vmem [thread:$0]  %s269_s0, 256, %s22_s10, [#allocation3], %s214_s19, %s214_s19, %s215_s20  }
  0x13   :  { %s216_s23 = smov [#allocation5]   ;;  %s163_s27 = scalar_lea.hbm %s270_s1, 256 }
  0x14   :  { %s39_s24 = sshll.u32 %s216_s23, 4  ;;  %p164_p8 = scmp.ne.s32.totalorder %s270_s1, %s163_s27  ;;  %s40_s24 = int_to_ptr.vmem [resolvable:$true] %s39_s24 }
  0x15   :  { %p167_p9 = scmp.lt.u32.totalorder %s163_s27, %s270_s1 }
  0x17   :  { %p169_p10 = pnand %p167_p9, %p164_p8 }
  0x19   :  { %172 = shalt.err (!%p169_p10)
}
  0x1a   :  { %s173_s4 = scalar_lea.vmem %s40_s24, 256  ;;  %p178_p12 = scmp.lt.s32.totalorder %s40_s24, %s40_s24 }
  0x1b   :  { %p174_p11 = scmp.ne.s32.totalorder %s40_s24, %s173_s4  ;;  %p179_p13 = scmp.lt.s32.totalorder %s173_s4, %s173_s4 }
  0x1d   :  { %p180_p0 = por %p179_p13, %p178_p12 }
  0x1f   :  { %p181_p1 = pnand %p180_p0, %p174_p11 }
  0x21   :  { %184 = shalt.err (!%p181_p1)
}
  0x22   :  { %45 = dma.hbm_to_vmem [thread:$0]  %s270_s1, 256, %s40_s24, [#allocation6], %s214_s19, %s214_s19, %s215_s20  }
  0x23   :  { %207 = dma.done.wait [#allocation3], 256  }
  0x24   :  { %208 = vsyncadd [#allocation3], 4294967040 }
  0x25   :  { %209 = dma.done.wait [#allocation6], 256  }
  0x26   :  { %210 = vsyncadd [#allocation6], 4294967040  ;;  %v65_v0 = vld [vmem:[#allocation2] sm:$0xff]  ;;  %v66_v1 = vld [vmem:[#allocation2 + $0x8] sm:$0xff]  ;;  %s217_s6 = smov [#allocation7]  }
  0x27   :  { %v69_v2 = vadd.f32 1e-08, %v65_v0  ;;  %v70_v3 = vadd.f32 1e-08, %v66_v1  ;;  %v67_v5 = vld [vmem:[#allocation5] sm:$0xff]  ;;  %v68_v7 = vld [vmem:[#allocation5 + $0x8] sm:$0xff] }
  0x28   :  { %s117_s1 = sshll.u32 %s217_s6, 4  ;;  %s118_s1 = int_to_ptr.vmem [resolvable:$true] %s117_s1 }
  0x29   :  { %137 = vlog2.f32 %v69_v2  ;;  %s185_s7 = scalar_lea.vmem %s118_s1, 128  ;;  %p190_p3 = scmp.lt.s32.totalorder %s118_s1, %s118_s1 }
  0x2a   :  { %139 = vlog2.f32 %v70_v3  ;;  %p186_p2 = scmp.ne.s32.totalorder %s118_s1, %s185_s7  ;;  %p191_p4 = scmp.lt.s32.totalorder %s185_s7, %s185_s7 }
  0x2c   :  { %p192_p5 = por %p191_p4, %p190_p3 }
  0x2e   :  { %p193_p6 = pnand %p192_p5, %p186_p2 }
  0x33   :  { %v138_v4 = vpop.eup %137 }
  0x34   :  { %v140_v6 = vpop.eup %139  ;;  %v72_v8 = vmul.f32 0.6931472, %v138_v4 }
  0x35   :  { %v74_v9 = vmul.f32 0.6931472, %v140_v6 }
  0x36   :  { %v75_v10 = vmul.f32 %v72_v8, %v67_v5 }
  0x37   :  { %v76_v11 = vmul.f32 %v74_v9, %v68_v7 }
  0x39   :  { %v85_v12 = vadd.f32 %v76_v11, %v75_v10 }
  0x3b   :  { %87 = vst [vmem:[#allocation7] sm:$0xff] %v85_v12 }
  0x3c   :  { %196 = shalt.err (!%p193_p6)
}
  0x3d   :  { %s197_s10 = scalar_lea.hbm %s271_s2, 128 }
  0x3e   :  { %p198_p7 = scmp.ne.s32.totalorder %s271_s2, %s197_s10  ;;  %p201_p8 = scmp.lt.u32.totalorder %s197_s10, %s271_s2 }
  0x40   :  { %p203_p9 = pnand %p201_p8, %p198_p7 }
  0x42   :  { %206 = shalt.err (!%p203_p9)
}
  0x43   :  { %120 = dma.vmem_to_hbm [thread:$0]  %s118_s1, 128, %s271_s2, [#allocation4]  }
  0x44   :  { %211 = dma.done.wait [#allocation4], 128  }
  0x45   :  { %212 = vsyncadd [#allocation4], 4294967168 }
  0x46   :  { %124 = vsyncpa [#allocation3], 1 }
  0x47   :  { %125 = vsyncpa [#allocation6], 1 }
  0x48   :  { %126 = vsyncpa [#allocation4], 1 }

</bundles_post_ra>
